<compile_context>
chip_gen: v7x
topology: tpu7x:2x2x1
jax: 0.10.0
libtpu: 0.0.40
codegen_flags: <defaults>
</compile_context>

<pallas_src>
import jax
import jax.numpy as jnp
from jax.experimental import pallas as pl
from jax.experimental.pallas import tpu as pltpu

NUM_ACTION = 8      # env.num_action (synthetic; the real env is not available here)


def _round_up(x, m):
    return ((x + m - 1) // m) * m


# ----------------------------------------------------------------------------- kernel
def dueling_qnet_kernel(x_ref, w1f_ref, b1_ref, w2f_ref, b2_ref,
                        w34_ref, b34_ref, wq_ref, bq_ref, out_ref):
    wdt = w1f_ref.dtype                                    # bf16 by default
    x = x_ref[...]                                         # (TB, 9) = [loc(5)|xe(2)|xo(2)]

    # (1) fused: layer1 on both neighbors + the state_loc part of layer2, one dot.
    fused = jnp.dot(x.astype(wdt), w1f_ref[...],
                    preferred_element_type=jnp.float32)    # (TB, 384)
    b1 = b1_ref[...]
    h0 = jnp.maximum(fused[:, 0:128] + b1, 0.0)            # relu(layer1(x[:,5:7]))
    h1 = jnp.maximum(fused[:, 128:256] + b1, 0.0)          # relu(layer1(x[:,7:9]))
    loc_c = fused[:, 256:384]                              # state_loc @ w2[:5]

    # torch.nanquantile(., 0.5, dim=0) over 2 stacked rows == nan-aware median of 2.
    mid = 0.5 * (h0 + h1)
    med = jnp.where(jnp.isnan(h0), h1, jnp.where(jnp.isnan(h1), h0, mid))   # (TB, 128)

    # (2) layer2: relu(loc@w2[:5] + med@w2[5:] + b2)
    h2 = jnp.maximum(
        loc_c
        + jnp.dot(med.astype(wdt), w2f_ref[...], preferred_element_type=jnp.float32)
        + b2_ref[...],
        0.0)                                               # (TB, 128)

    # (3) fused layer3 | layer4 -> [adv_h | val_h]
    h34 = jnp.maximum(
        jnp.dot(h2.astype(wdt), w34_ref[...], preferred_element_type=jnp.float32)
        + b34_ref[...],
        0.0)                                               # (TB, 128)

    # (4) pre-centered layer5 + tiled layer6 -> Q (dueling combine already folded in)
    out_ref[...] = (
        jnp.dot(h34.astype(wdt), wq_ref[...], preferred_element_type=jnp.float32)
        + bq_ref[...])                                     # (TB, num_action)


# ----------------------------------------------------------------------------- weight fusion
def fuse_params(p, num_action=NUM_ACTION, weight_dtype=jnp.bfloat16):
    """Re-pack the 6 Linear layers into 4 well-shaped matmul operands (done once).

    All folding arithmetic (block-diag, mean-centering of w5) is done in f32 and only
    the final operands are cast to `weight_dtype`. Biases stay f32.
    """
    w1, b1 = p["w1"], p["b1"]                     # (2,128), (1,128)
    w2, b2 = p["w2"], p["b2"]                     # (133,128), (1,128)
    w2l, w2f = w2[:5, :], w2[5:, :]

    # block-diag(w1, w1, w2l): x columns are [loc(0:5) | xe(5:7) | xo(7:9)]
    w1f = jnp.zeros((9, 384), jnp.float32)
    w1f = w1f.at[5:7, 0:128].set(w1)
    w1f = w1f.at[7:9, 128:256].set(w1)
    w1f = w1f.at[0:5, 256:384].set(w2l)

    # concat layer3|layer4
    w34 = jnp.concatenate([p["w3"], p["w4"]], axis=1)      # (128, 128)
    b34 = jnp.concatenate([p["b3"], p["b4"]], axis=1)      # (1, 128)

    # pre-center advantage head (f32), tile value head across action lanes
    w5c = p["w5"] - jnp.mean(p["w5"], axis=1, keepdims=True)     # (64, A)
    b5c = p["b5"] - jnp.mean(p["b5"], axis=1, keepdims=True)     # (1, A)
    wq = jnp.concatenate(
        [w5c, jnp.broadcast_to(p["w6"], (64, num_action))], axis=0)   # (128, A)
    bq = b5c + p["b6"]                                                  # (1, A)

    wd = weight_dtype   # bf16: native MXU path on v5e/v6e/v7x; biases stay f32
    return {
        "w1f": w1f.astype(wd), "b1": b1.astype(jnp.float32),
        "w2f": w2f.astype(wd), "b2": b2.astype(jnp.float32),
        "w34": w34.astype(wd), "b34": b34.astype(jnp.float32),
        "wq": wq.astype(wd),   "bq": bq.astype(jnp.float32),
    }


# ----------------------------------------------------------------------------- wrapper
def net_forward(x, fp, num_action=NUM_ACTION, tile_b=1024):
    B, F = x.shape
    assert F == 9, "this Net expects 5 loc features + 2 neighbor pairs (K=2)"

    # Tile selection:
    #  * cap so the grid has >= 2 steps when B >= 16 (v7x dual-TC via "parallel"),
    #  * prefer a tile that divides B exactly (avoids a wrapper-side pad pass),
    #  * always a multiple of 8 (sublane constraint on the block's 2nd-to-last dim).
    cap = max(8, _round_up((B + 1) // 2, 8))
    tb = min(tile_b, cap)
    tb = max(8, (tb // 8) * 8)
    if B % tb != 0:
        floor = max(8, tb // 2)          # don't shrink below half-tile just to divide
        for cand in range(tb, floor - 1, -8):
            if B % cand == 0:
                tb = cand
                break

    n_tiles = pl.cdiv(B, tb)
    Bp = n_tiles * tb
    if Bp != B:
        # rare fallback (B not a multiple of 8 / no good divisor); rows are sliced off
        x = jnp.pad(x, ((0, Bp - B), (0, 0)))

    act_spec = pl.BlockSpec((tb, 9), lambda i: (i, 0))
    out_spec = pl.BlockSpec((tb, num_action), lambda i: (i, 0))

    def weight_spec(arr):
        # full-array block, constant index map -> stays VMEM-resident across grid steps
        return pl.BlockSpec(arr.shape, lambda i: (0, 0))

    args = (x, fp["w1f"], fp["b1"], fp["w2f"], fp["b2"],
            fp["w34"], fp["b34"], fp["wq"], fp["bq"])
    in_specs = [act_spec] + [weight_spec(a) for a in args[1:]]

    # VMEM budget: fused(tb,384) f32 + ~6 x (tb,128) f32 intermediates, double-buffered
    # x/out blocks, ~0.2 MiB bf16 weights; x2 headroom. Covers v5e's 16 MiB scoped
    # default and stays well under v7x's 64 MiB physical.
    est = tb * (384 + 6 * 128) * 4 * 2 + (4 << 20)
    vmem_limit = int(min(48 << 20, max(16 << 20, est)))

    out = pl.pallas_call(
        dueling_qnet_kernel,
        out_shape=jax.ShapeDtypeStruct((Bp, num_action), jnp.float32),
        grid=(n_tiles,),
        in_specs=in_specs,
        out_specs=out_spec,
        compiler_params=pltpu.CompilerParams(
            dimension_semantics=("parallel",),
            vmem_limit_bytes=vmem_limit),
    )(*args)

    return out if Bp == B else out[:B]


# ----------------------------------------------------------------------------- params
def init_params(key, num_action):
    """Deterministic init mimicking torch.nn.Linear defaults (U(-1/sqrt(fan_in), +))."""
    def linear(k, fan_in, fan_out):
        kw, kb = jax.random.split(k)
        bound = 1.0 / (fan_in ** 0.5)
        w = jax.random.uniform(kw, (fan_in, fan_out), jnp.float32, -bound, bound)
        b = jax.random.uniform(kb, (1, fan_out), jnp.float32, -bound, bound)
        return w, b

    k1, k2, k3, k4, k5, k6 = jax.random.split(key, 6)
    p = {}
    p["w1"], p["b1"] = linear(k1, 2, 128)
    p["w2"], p["b2"] = linear(k2, 128 + 5, 128)
    p["w3"], p["b3"] = linear(k3, 128, 64)
    p["w4"], p["b4"] = linear(k4, 128, 64)
    p["w5"], p["b5"] = linear(k5, 64, num_action)
    p["w6"], p["b6"] = linear(k6, 64, 1)
    return p


# ----------------------------------------------------------------------------- reference
def net_forward_ref(x, p):
    """Plain-JAX transcription of the PyTorch forward (correctness check)."""
    state_loc = x[:, :5]
    state_ij = x[:, 5:]
    h = jax.nn.relu(state_ij.reshape(-1, 2) @ p["w1"] + p["b1"])
    feature = jnp.vstack((h[0::2, :].reshape(1, -1), h[1::2, :].reshape(1, -1)))
    med = jnp.nanquantile(feature, 0.5, axis=0).reshape(-1, h.shape[1])
    mf = jnp.hstack((state_loc, med))
    h2 = jax.nn.relu(mf @ p["w2"] + p["b2"])
    adv = jax.nn.relu(h2 @ p["w3"] + p["b3"]) @ p["w5"] + p["b5"]
    val = jax.nn.relu(h2 @ p["w4"] + p["b4"]) @ p["w6"] + p["b6"]
    return val + adv - jnp.mean(adv, axis=1, keepdims=True)


# ----------------------------------------------------------------------------- main
if __name__ == "__main__":
    key = jax.random.PRNGKey(0)
    k_params, k_x = jax.random.split(key)

    B = 8
    params = init_params(k_params, NUM_ACTION)
    # observation: 5 "state_loc" features + 2 neighbor (i,j) pairs -> 9 columns
    x = jax.random.uniform(k_x, (B, 9), jnp.float32, -1.0, 1.0)

    ref = net_forward_ref(x, params)

    # 1) semantics check with f32 weights (tight tolerance)
    fp_f32 = fuse_params(params, weight_dtype=jnp.float32)
    out_f32 = jax.block_until_ready(net_forward(x, fp_f32))
    assert out_f32.shape == (B, NUM_ACTION)
    assert jnp.allclose(out_f32, ref, atol=1e-4, rtol=1e-4), "f32 mismatch vs reference"

    # 2) default fast path: bf16 weights / f32 accumulation (loose tolerance vs f32 ref)
    fp_bf16 = fuse_params(params)                      # bf16 by default
    out = jax.block_until_ready(net_forward(x, fp_bf16))
    assert out.shape == (B, NUM_ACTION)
    assert jnp.allclose(out, ref, atol=5e-2, rtol=5e-2), "bf16 mismatch vs reference"

    print("KERNEL_OK")
</pallas_src>

<mosaic_0001>
module attributes {stable_mosaic.version = 11 : i64} {
  func.func @dueling_qnet_kernel(%arg0: i32, %arg1: memref<8x9xf32, #tpu.memory_space<vmem>>, %arg2: memref<9x384xf32, #tpu.memory_space<vmem>>, %arg3: memref<1x128xf32, #tpu.memory_space<vmem>>, %arg4: memref<128x128xf32, #tpu.memory_space<vmem>>, %arg5: memref<1x128xf32, #tpu.memory_space<vmem>>, %arg6: memref<128x128xf32, #tpu.memory_space<vmem>>, %arg7: memref<1x128xf32, #tpu.memory_space<vmem>>, %arg8: memref<128x8xf32, #tpu.memory_space<vmem>>, %arg9: memref<1x8xf32, #tpu.memory_space<vmem>>, %arg10: memref<8x8xf32, #tpu.memory_space<vmem>>) attributes {dimension_semantics = [#tpu.dimension_semantics<parallel>], iteration_bounds = array<i64: 1>, scalar_prefetch = 0 : i64, scratch_operands = 0 : i64, tpu.core_type = #tpu.core_type<tc>, window_params = [{transform_indices = @transform_0, window_bounds = array<i64: 8, 9>}, {pipeline_mode = #tpu.pipeline_mode<synchronous>, transform_indices = @transform_1, window_bounds = array<i64: 9, 384>}, {pipeline_mode = #tpu.pipeline_mode<synchronous>, transform_indices = @transform_2, window_bounds = array<i64: 1, 128>}, {pipeline_mode = #tpu.pipeline_mode<synchronous>, transform_indices = @transform_3, window_bounds = array<i64: 128, 128>}, {pipeline_mode = #tpu.pipeline_mode<synchronous>, transform_indices = @transform_4, window_bounds = array<i64: 1, 128>}, {pipeline_mode = #tpu.pipeline_mode<synchronous>, transform_indices = @transform_5, window_bounds = array<i64: 128, 128>}, {pipeline_mode = #tpu.pipeline_mode<synchronous>, transform_indices = @transform_6, window_bounds = array<i64: 1, 128>}, {pipeline_mode = #tpu.pipeline_mode<synchronous>, transform_indices = @transform_7, window_bounds = array<i64: 128, 8>}, {pipeline_mode = #tpu.pipeline_mode<synchronous>, transform_indices = @transform_8, window_bounds = array<i64: 1, 8>}, {transform_indices = @transform_9, window_bounds = array<i64: 8, 8>}]} {
    %c0 = arith.constant 0 : index
    %c0_0 = arith.constant 0 : index
    %0 = vector.load %arg1[%c0, %c0_0] : memref<8x9xf32, #tpu.memory_space<vmem>>, vector<8x9xf32>
    %c0_1 = arith.constant 0 : index
    %c0_2 = arith.constant 0 : index
    %1 = vector.load %arg2[%c0_1, %c0_2] : memref<9x384xf32, #tpu.memory_space<vmem>>, vector<9x384xf32>
    %cst = arith.constant dense<0.000000e+00> : vector<8x384xf32>
    %2 = tpu.matmul %0, %1, %cst {dimension_numbers = #tpu.dot_dimension_numbers<[1], [0], [0], [1], [0, 0, 1, 1], [], []>} : vector<8x9xf32>, vector<9x384xf32>, vector<8x384xf32> -> vector<8x384xf32>
    %c0_3 = arith.constant 0 : index
    %c0_4 = arith.constant 0 : index
    %3 = vector.load %arg3[%c0_3, %c0_4] : memref<1x128xf32, #tpu.memory_space<vmem>>, vector<1x128xf32>
    %4 = vector.extract_strided_slice %2 {offsets = [0, 0], sizes = [8, 128], strides = [1, 1]} : vector<8x384xf32> to vector<8x128xf32>
    %5 = vector.broadcast %3 : vector<1x128xf32> to vector<8x128xf32>
    %6 = arith.addf %4, %5 : vector<8x128xf32>
    %cst_5 = arith.constant 0.000000e+00 : f32
    %7 = vector.broadcast %cst_5 : f32 to vector<8x128xf32>
    %8 = arith.maximumf %6, %7 : vector<8x128xf32>
    %9 = vector.extract_strided_slice %2 {offsets = [0, 128], sizes = [8, 128], strides = [1, 1]} : vector<8x384xf32> to vector<8x128xf32>
    %10 = vector.broadcast %3 : vector<1x128xf32> to vector<8x128xf32>
    %11 = arith.addf %9, %10 : vector<8x128xf32>
    %cst_6 = arith.constant 0.000000e+00 : f32
    %12 = vector.broadcast %cst_6 : f32 to vector<8x128xf32>
    %13 = arith.maximumf %11, %12 : vector<8x128xf32>
    %14 = vector.extract_strided_slice %2 {offsets = [0, 256], sizes = [8, 128], strides = [1, 1]} : vector<8x384xf32> to vector<8x128xf32>
    %15 = arith.addf %8, %13 : vector<8x128xf32>
    %cst_7 = arith.constant 5.000000e-01 : f32
    %16 = vector.broadcast %cst_7 : f32 to vector<8x128xf32>
    %17 = arith.mulf %16, %15 : vector<8x128xf32>
    %18 = arith.cmpf one, %8, %8 : vector<8x128xf32>
    %19 = arith.cmpf one, %13, %13 : vector<8x128xf32>
    %20 = arith.select %19, %8, %17 : vector<8x128xi1>, vector<8x128xf32>
    %21 = arith.select %18, %13, %20 : vector<8x128xi1>, vector<8x128xf32>
    %c0_8 = arith.constant 0 : index
    %c0_9 = arith.constant 0 : index
    %22 = vector.load %arg4[%c0_8, %c0_9] : memref<128x128xf32, #tpu.memory_space<vmem>>, vector<128x128xf32>
    %cst_10 = arith.constant dense<0.000000e+00> : vector<8x128xf32>
    %23 = tpu.matmul %21, %22, %cst_10 {dimension_numbers = #tpu.dot_dimension_numbers<[1], [0], [0], [1], [0, 0, 1, 1], [], []>} : vector<8x128xf32>, vector<128x128xf32>, vector<8x128xf32> -> vector<8x128xf32>
    %24 = arith.addf %14, %23 : vector<8x128xf32>
    %c0_11 = arith.constant 0 : index
    %c0_12 = arith.constant 0 : index
    %25 = vector.load %arg5[%c0_11, %c0_12] : memref<1x128xf32, #tpu.memory_space<vmem>>, vector<1x128xf32>
    %26 = vector.broadcast %25 : vector<1x128xf32> to vector<8x128xf32>
    %27 = arith.addf %24, %26 : vector<8x128xf32>
    %cst_13 = arith.constant 0.000000e+00 : f32
    %28 = vector.broadcast %cst_13 : f32 to vector<8x128xf32>
    %29 = arith.maximumf %27, %28 : vector<8x128xf32>
    %c0_14 = arith.constant 0 : index
    %c0_15 = arith.constant 0 : index
    %30 = vector.load %arg6[%c0_14, %c0_15] : memref<128x128xf32, #tpu.memory_space<vmem>>, vector<128x128xf32>
    %cst_16 = arith.constant dense<0.000000e+00> : vector<8x128xf32>
    %31 = tpu.matmul %29, %30, %cst_16 {dimension_numbers = #tpu.dot_dimension_numbers<[1], [0], [0], [1], [0, 0, 1, 1], [], []>} : vector<8x128xf32>, vector<128x128xf32>, vector<8x128xf32> -> vector<8x128xf32>
    %c0_17 = arith.constant 0 : index
    %c0_18 = arith.constant 0 : index
    %32 = vector.load %arg7[%c0_17, %c0_18] : memref<1x128xf32, #tpu.memory_space<vmem>>, vector<1x128xf32>
    %33 = vector.broadcast %32 : vector<1x128xf32> to vector<8x128xf32>
    %34 = arith.addf %31, %33 : vector<8x128xf32>
    %cst_19 = arith.constant 0.000000e+00 : f32
    %35 = vector.broadcast %cst_19 : f32 to vector<8x128xf32>
    %36 = arith.maximumf %34, %35 : vector<8x128xf32>
    %c0_20 = arith.constant 0 : index
    %c0_21 = arith.constant 0 : index
    %37 = vector.load %arg8[%c0_20, %c0_21] : memref<128x8xf32, #tpu.memory_space<vmem>>, vector<128x8xf32>
    %cst_22 = arith.constant dense<0.000000e+00> : vector<8x8xf32>
    %38 = tpu.matmul %36, %37, %cst_22 {dimension_numbers = #tpu.dot_dimension_numbers<[1], [0], [0], [1], [0, 0, 1, 1], [], []>} : vector<8x128xf32>, vector<128x8xf32>, vector<8x8xf32> -> vector<8x8xf32>
    %c0_23 = arith.constant 0 : index
    %c0_24 = arith.constant 0 : index
    %39 = vector.load %arg9[%c0_23, %c0_24] : memref<1x8xf32, #tpu.memory_space<vmem>>, vector<1x8xf32>
    %40 = vector.broadcast %39 : vector<1x8xf32> to vector<8x8xf32>
    %41 = arith.addf %38, %40 : vector<8x8xf32>
    %c0_25 = arith.constant 0 : index
    %c0_26 = arith.constant 0 : index
    %42 = vector.load %arg10[%c0_25, %c0_26] : memref<8x8xf32, #tpu.memory_space<vmem>>, vector<8x8xf32>
    tpu.vector_store %arg10[%c0_25, %c0_26], %41 {strides = array<i32>} : memref<8x8xf32, #tpu.memory_space<vmem>>, vector<8x8xf32>,
    return
  }
  func.func @transform_0(%arg0: i32) -> (i32, i32) {
    %c0_i32 = arith.constant 0 : i32
    %c0_i32_0 = arith.constant 0 : i32
    return %arg0, %c0_i32 : i32, i32
  }
  func.func @transform_1(%arg0: i32) -> (i32, i32) {
    %c0_i32 = arith.constant 0 : i32
    %c0_i32_0 = arith.constant 0 : i32
    %c0_i32_1 = arith.constant 0 : i32
    return %c0_i32, %c0_i32_0 : i32, i32
  }
  func.func @transform_2(%arg0: i32) -> (i32, i32) {
    %c0_i32 = arith.constant 0 : i32
    %c0_i32_0 = arith.constant 0 : i32
    %c0_i32_1 = arith.constant 0 : i32
    return %c0_i32, %c0_i32_0 : i32, i32
  }
  func.func @transform_3(%arg0: i32) -> (i32, i32) {
    %c0_i32 = arith.constant 0 : i32
    %c0_i32_0 = arith.constant 0 : i32
    %c0_i32_1 = arith.constant 0 : i32
    return %c0_i32, %c0_i32_0 : i32, i32
  }
  func.func @transform_4(%arg0: i32) -> (i32, i32) {
    %c0_i32 = arith.constant 0 : i32
    %c0_i32_0 = arith.constant 0 : i32
    %c0_i32_1 = arith.constant 0 : i32
    return %c0_i32, %c0_i32_0 : i32, i32
  }
  func.func @transform_5(%arg0: i32) -> (i32, i32) {
    %c0_i32 = arith.constant 0 : i32
    %c0_i32_0 = arith.constant 0 : i32
    %c0_i32_1 = arith.constant 0 : i32
    return %c0_i32, %c0_i32_0 : i32, i32
  }
  func.func @transform_6(%arg0: i32) -> (i32, i32) {
    %c0_i32 = arith.constant 0 : i32
    %c0_i32_0 = arith.constant 0 : i32
    %c0_i32_1 = arith.constant 0 : i32
    return %c0_i32, %c0_i32_0 : i32, i32
  }
  func.func @transform_7(%arg0: i32) -> (i32, i32) {
    %c0_i32 = arith.constant 0 : i32
    %c0_i32_0 = arith.constant 0 : i32
    %c0_i32_1 = arith.constant 0 : i32
    return %c0_i32, %c0_i32_0 : i32, i32
  }
  func.func @transform_8(%arg0: i32) -> (i32, i32) {
    %c0_i32 = arith.constant 0 : i32
    %c0_i32_0 = arith.constant 0 : i32
    %c0_i32_1 = arith.constant 0 : i32
    return %c0_i32, %c0_i32_0 : i32, i32
  }
  func.func @transform_9(%arg0: i32) -> (i32, i32) {
    %c0_i32 = arith.constant 0 : i32
    %c0_i32_0 = arith.constant 0 : i32
    return %arg0, %c0_i32 : i32, i32
  }
}

</mosaic_0001>

<bundles_post_ra>
// kernel: tpu_custom_call.1
= control target key start
LH: loop header
LB: loop body
LE: loop exit
PB: predicated region body
PF: predicated region fallthrough
CT: control target
= control target key end

     0   :  { %14 = vsyncpa [#allocation3], 0  ;;  %s1135_s0 = inlined_call_operand.vmem [shape: f32[8,9], index: 0, kind: input, shape index: {}]   ;;  %s1136_s1 = inlined_call_operand.hbm [shape: f32[9,384], index: 1, kind: input, shape index: {}]   ;;  %s1137_s2 = inlined_call_operand.vmem [shape: f32[1,128], index: 2, kind: input, shape index: {}]   ;;  %s1138_s3 = inlined_call_operand.vmem [shape: f32[128,128], index: 3, kind: input, shape index: {}]   ;;  %s1139_s4 = inlined_call_operand.vmem [shape: f32[1,128], index: 4, kind: input, shape index: {}]   ;;  %s1140_s5 = inlined_call_operand.hbm [shape: f32[128,128], index: 5, kind: input, shape index: {}]   ;;  %s1141_s6 = inlined_call_operand.vmem [shape: f32[1,128], index: 6, kind: input, shape index: {}]   ;;  %s1142_s7 = inlined_call_operand.vmem [shape: f32[128,8], index: 7, kind: input, shape index: {}]   ;;  %s1143_s8 = inlined_call_operand.vmem [shape: f32[1,8], index: 8, kind: input, shape index: {}]   ;;  %s1144_s9 = inlined_call_operand.hbm [shape: f32[8,8], index: 9, kind: output, shape index: {}]  }
   0x1   :  { %15 = vsyncpa [#allocation6], 0 }
   0x2   :  { %16 = vsyncpa [#allocation4], 0  ;;  %s881_s30 = smov [#allocation2]   ;;  %s809_s13 = scalar_lea.hbm %s1136_s1, 768 }
   0x3   :  { %s24_s10 = sshll.u32 %s881_s30, 4  ;;  %p810_p0 = scmp.ne.s32.totalorder %s1136_s1, %s809_s13  ;;  %s25_s10 = int_to_ptr.vmem [resolvable:$true] %s24_s10 }
   0x4   :  { %p813_p1 = scmp.lt.u32.totalorder %s809_s13, %s1136_s1 }
   0x6   :  { %p815_p2 = pnand %p813_p1, %p810_p0 }
   0x8   :  { %818 = shalt.err (!%p815_p2)
}
   0x9   :  { %s819_s18 = scalar_lea.vmem %s25_s10, 768  ;;  %p824_p4 = scmp.lt.s32.totalorder %s25_s10, %s25_s10 }
   0xa   :  { %p820_p3 = scmp.ne.s32.totalorder %s25_s10, %s819_s18  ;;  %p825_p5 = scmp.lt.s32.totalorder %s819_s18, %s819_s18 }
   0xc   :  { %p826_p6 = por %p825_p5, %p824_p4 }
   0xe   :  { %p827_p7 = pnand %p826_p6, %p820_p3 }
  0x10   :  { %830 = shalt.err (!%p827_p7)
}
  0x11   :  { %s882_s19 = smov 384   ;;  %s883_s20 = smov 24  }
  0x12   :  { %30 = dma.hbm_to_vmem [thread:$0]  %s1136_s1, 768, %s25_s10, [#allocation3], %s882_s19, %s882_s19, %s883_s20  }
  0x13   :  { %s884_s23 = smov [#allocation5]   ;;  %s831_s27 = scalar_lea.hbm %s1140_s5, 2048 }
  0x14   :  { %s42_s24 = sshll.u32 %s884_s23, 4  ;;  %p832_p8 = scmp.ne.s32.totalorder %s1140_s5, %s831_s27  ;;  %s43_s24 = int_to_ptr.vmem [resolvable:$true] %s42_s24 }
  0x15   :  { %p835_p9 = scmp.lt.u32.totalorder %s831_s27, %s1140_s5 }
  0x17   :  { %p837_p10 = pnand %p835_p9, %p832_p8 }
  0x19   :  { %840 = shalt.err (!%p837_p10)
}
  0x1a   :  { %s841_s12 = scalar_lea.vmem %s43_s24, 2048  ;;  %p846_p12 = scmp.lt.s32.totalorder %s43_s24, %s43_s24 }
  0x1b   :  { %p842_p11 = scmp.ne.s32.totalorder %s43_s24, %s841_s12  ;;  %p847_p13 = scmp.lt.s32.totalorder %s841_s12, %s841_s12 }
  0x1d   :  { %p848_p0 = por %p847_p13, %p846_p12 }
  0x1f   :  { %p849_p1 = pnand %p848_p0, %p842_p11 }
  0x21   :  { %852 = shalt.err (!%p849_p1)
}
  0x22   :  { %s885_s1 = smov 128   ;;  %s886_s10 = smov 8  }
  0x23   :  { %48 = dma.hbm_to_vmem [thread:$0]  %s1140_s5, 2048, %s43_s24, [#allocation6], %s885_s1, %s885_s1, %s886_s10  }
  0x24   :  { %875 = dma.done.wait [#allocation3], 768  }
  0x25   :  { %876 = vsyncadd [#allocation3], 4294966528 }
  0x26   :  { %877 = dma.done.wait [#allocation6], 2048  }
  0x27   :  { %878 = vsyncadd [#allocation6], 4294965248  ;;  %v887_v0 = vmov 0.0   ;;  %v888_v1 = vmov 0.0|0.0   ;;  %vm72_vm0 = vcmask 1040384   ;;  %vm889_vm1 = vmmov 1  }
  0x28   :  { %146 = vmatprep.mubr.f32.mxu1 %v887_v0  ;;  %726 = vmatprep.subr.bf16.mxu0 %v888_v1  ;;  %vm968_vm2 = vmpackc.low %vm72_vm0, %vm889_vm1  ;;  %v63_v3 = vld [vmem:[#allocation2 + $0x8] sm:$0xff]  ;;  %v66_v4 = vld [vmem:[#allocation2 + $0x20] sm:$0x1]  ;;  %vm68_vm3 = vcmask 72704   ;;  %vm890_vm4 = vmmov 0   ;;  %s891_s10 = smov [#allocation7]  }
  0x29   :  { %v62_v5 = vld [vmem:[#allocation2] sm:$0xff]  ;;  %v716_v6 = vpack.c.bf16 %v66_v4, %v63_v3  ;;  %v65_v7 = vld [vmem:[#allocation2 + $0x18] sm:$0x1]  ;;  %v241_v10 = vld [vmem:[%s1138_s3 + $0x8] sm:$0xff]  ;;  %643 = vmatprep.mubr.msk.f32.mxu0 %vm890_vm4, %v887_v0  ;;  %s531_s13 = sshll.u32 %s891_s10, 4  ;;  %vm523_vm7 = vcmask 64512   ;;  %s532_s13 = int_to_ptr.vmem [resolvable:$true] %s531_s13 }
  0x2a   :  { %v240_v8 = vld [vmem:[%s1138_s3] sm:$0xff]  ;;  %v719_v9 = vpack.c.bf16 %v65_v7, %v62_v5  ;;  %v242_v11 = vld [vmem:[%s1138_s3 + $0x10] sm:$0xff]  ;;  %v243_v12 = vld [vmem:[%s1138_s3 + $0x18] sm:$0xff]  ;;  %p858_p3 = scmp.lt.s32.totalorder %s532_s13, %s532_s13 }
  0x2b   :  { %718 = vmatprep.subr.msk.bf16.mxu1 %vm968_vm2, %v716_v6  ;;  %v727_v13 = vpack.c.bf16 %v241_v10, %v240_v8  ;;  %v61_v14 = vld [vmem:[%s1135_s0] sm:$0xff]  ;;  %v730_v15 = vpack.c.bf16 %v243_v12, %v242_v11  ;;  %v245_v17 = vld [vmem:[%s1138_s3 + $0x28] sm:$0xff]  ;;  %v246_v19 = vld [vmem:[%s1138_s3 + $0x30] sm:$0xff] }
  0x2c   :  { %721 = vmatpush1.bf16.msk.msra.mxu1 %vm968_vm2, %v719_v9  ;;  %v244_v16 = vld [vmem:[%s1138_s3 + $0x20] sm:$0xff]  ;;  %v247_v20 = vld [vmem:[%s1138_s3 + $0x38] sm:$0xff]  ;;  %v249_v23 = vld [vmem:[%s1138_s3 + $0x48] sm:$0xff] }
  0x2d   :  { %728 = vmatpush3.bf16.msra.mxu0 %v727_v13  ;;  %722 = vmatprep.subr.bf16.mxu1 %v888_v1  ;;  %v733_v18 = vpack.c.bf16 %v245_v17, %v244_v16  ;;  %v736_v21 = vpack.c.bf16 %v247_v20, %v246_v19  ;;  %v248_v22 = vld [vmem:[%s1138_s3 + $0x40] sm:$0xff]  ;;  %v250_v25 = vld [vmem:[%s1138_s3 + $0x50] sm:$0xff]  ;;  %v251_v26 = vld [vmem:[%s1138_s3 + $0x58] sm:$0xff] }
  0x2e   :  { %729 = vmatprep.subr.bf16.mxu0 %v888_v1  ;;  %v739_v24 = vpack.c.bf16 %v249_v23, %v248_v22  ;;  %v742_v27 = vpack.c.bf16 %v251_v26, %v250_v25  ;;  %v252_v28 = vld [vmem:[%s1138_s3 + $0x60] sm:$0xff]  ;;  %v253_v29 = vld [vmem:[%s1138_s3 + $0x68] sm:$0xff]  ;;  %v64_v31 = vld [vmem:[#allocation2 + $0x10] sm:$0xff] }
  0x2f   :  { %543 = vmatmul.mubr.msk.f32.vlgmr.msra.gmra.mrb[0].mxu1 %vm68_vm3, %v61_v14  ;;  %v745_v30 = vpack.c.bf16 %v253_v29, %v252_v28  ;;  %v67_v32 = vld [vmem:[#allocation2 + $0x28] sm:$0x1]  ;;  %v254_v34 = vld [vmem:[%s1138_s3 + $0x70] sm:$0xff]  ;;  %v255_v35 = vld [vmem:[%s1138_s3 + $0x78] sm:$0xff] }
  0x30   :  { %v723_v33 = vpack.c.bf16 %v67_v32, %v64_v31  ;;  %v748_v36 = vpack.c.bf16 %v255_v35, %v254_v34  ;;  %608 = vmatprep.mubr.msk.f32.mxu1 %vm890_vm4, %v887_v0  ;;  %v336_v37 = vld [vmem:[#allocation5] sm:$0xff]  ;;  %v337_v38 = vld [vmem:[#allocation5 + $0x8] sm:$0xff]  ;;  %v338_v39 = vld [vmem:[#allocation5 + $0x10] sm:$0xff] }
  0x31   :  { %731 = vmatpush3.bf16.msra.mxu0 %v730_v15  ;;  %v751_v40 = vpack.c.bf16 %v337_v38, %v336_v37  ;;  %v339_v41 = vld [vmem:[#allocation5 + $0x18] sm:$0xff]  ;;  %v340_v43 = vld [vmem:[#allocation5 + $0x20] sm:$0xff]  ;;  %v341_v44 = vld [vmem:[#allocation5 + $0x28] sm:$0xff] }
  0x32   :  { %732 = vmatprep.subr.bf16.mxu0 %v888_v1  ;;  %725 = vmatpush3.bf16.msk.msra.mxu1 %vm968_vm2, %v723_v33  ;;  %v754_v42 = vpack.c.bf16 %v339_v41, %v338_v39  ;;  %v757_v45 = vpack.c.bf16 %v341_v44, %v340_v43  ;;  %v342_v46 = vld [vmem:[#allocation5 + $0x30] sm:$0xff]  ;;  %v343_v47 = vld [vmem:[#allocation5 + $0x38] sm:$0xff]  ;;  %v344_v49 = vld [vmem:[#allocation5 + $0x40] sm:$0xff] }
  0x33   :  { %750 = vmatprep.subr.bf16.mxu1 %v888_v1  ;;  %v760_v48 = vpack.c.bf16 %v343_v47, %v342_v46  ;;  %v345_v50 = vld [vmem:[#allocation5 + $0x48] sm:$0xff]  ;;  %v346_v52 = vld [vmem:[#allocation5 + $0x50] sm:$0xff]  ;;  %v347_v53 = vld [vmem:[#allocation5 + $0x58] sm:$0xff] }
  0x34   :  { %v763_v51 = vpack.c.bf16 %v345_v50, %v344_v49  ;;  %v766_v54 = vpack.c.bf16 %v347_v53, %v346_v52  ;;  %v546_v55 = vld [vmem:[%s1137_s2] ss:$0 sm:$0xff]  ;;  %v348_v4 = vld [vmem:[#allocation5 + $0x60] sm:$0xff]  ;;  %v349_v5 = vld [vmem:[#allocation5 + $0x68] sm:$0xff] }
  0x35   :  { %734 = vmatpush3.bf16.msra.mxu0 %v733_v18  ;;  %609 = vmatmul.mubr.msk.f32.vlgmr.msra.gmra.mrb[2].mxu1 %vm68_vm3, %v61_v14  ;;  %v769_v6 = vpack.c.bf16 %v349_v5, %v348_v4  ;;  %v350_v9 = vld [vmem:[#allocation5 + $0x70] sm:$0xff]  ;;  %v351_v10 = vld [vmem:[#allocation5 + $0x78] sm:$0xff]  ;;  %v432_v13 = vld [vmem:[%s1142_s7 + $0x10] sm:$0xff] }
  0x36   :  { %735 = vmatprep.subr.bf16.mxu0 %v888_v1  ;;  %678 = vmatprep.mubr.msk.f32.mxu1 %vm890_vm4, %v887_v0  ;;  %v772_v11 = vpack.c.bf16 %v351_v10, %v350_v9  ;;  %v430_v12 = vld [vmem:[%s1142_s7] sm:$0xff]  ;;  %v433_v15 = vld [vmem:[%s1142_s7 + $0x18] sm:$0xff]  ;;  %v435_v18 = vld [vmem:[%s1142_s7 + $0x28] sm:$0xff] }
  0x37   :  { %752 = vmatpush3.bf16.msra.mxu1 %v751_v40  ;;  %v778_v16 = vpack.c.bf16 %v433_v15, %v432_v13  ;;  %v434_v17 = vld [vmem:[%s1142_s7 + $0x20] sm:$0xff]  ;;  %v436_v20 = vld [vmem:[%s1142_s7 + $0x30] sm:$0xff]  ;;  %v445_v39 = vld [vmem:[%s1142_s7 + $0x78] sm:$0xff] }
  0x38   :  { %753 = vmatprep.subr.bf16.mxu1 %v888_v1  ;;  %v781_v19 = vpack.c.bf16 %v435_v18, %v434_v17  ;;  %v438_v23 = vld [vmem:[%s1142_s7 + $0x40] sm:$0xff]  ;;  %v440_v26 = vld [vmem:[%s1142_s7 + $0x50] sm:$0xff] }
  0x39   :  { %737 = vmatpush3.bf16.msra.mxu0 %v736_v21  ;;  %v437_v21 = vld [vmem:[%s1142_s7 + $0x38] sm:$0xff]  ;;  %v442_v29 = vld [vmem:[%s1142_s7 + $0x60] sm:$0xff]  ;;  %v444_v38 = vld [vmem:[%s1142_s7 + $0x70] sm:$0xff] }
  0x3a   :  { %738 = vmatprep.subr.bf16.mxu0 %v888_v1  ;;  %v784_v22 = vpack.c.bf16 %v437_v21, %v436_v20  ;;  %v547_v33 = vld [vmem:[%s1139_s4] ss:$0 sm:$0xff]  ;;  %v796_v40 = vpack.c.bf16 %v445_v39, %v444_v38 }
  0x3b   :  { %755 = vmatpush3.bf16.msra.mxu1 %v754_v42 }
  0x3c   :  { %756 = vmatprep.subr.bf16.mxu1 %v888_v1 }
  0x3d   :  { %740 = vmatpush3.bf16.msra.mxu0 %v739_v24  ;;  %v439_v24 = vld [vmem:[%s1142_s7 + $0x48] sm:$0xff] }
  0x3e   :  { %741 = vmatprep.subr.bf16.mxu0 %v888_v1  ;;  %v787_v25 = vpack.c.bf16 %v439_v24, %v438_v23 }
  0x3f   :  { %758 = vmatpush3.bf16.msra.mxu1 %v757_v45  ;;  %v549_v45 = vld [vmem:[%s1143_s8] ss:$0 sm:$0xff] }
  0x40   :  { %759 = vmatprep.subr.bf16.mxu1 %v888_v1 }
  0x41   :  { %743 = vmatpush3.bf16.msra.mxu0 %v742_v27  ;;  %v441_v27 = vld [vmem:[%s1142_s7 + $0x58] sm:$0xff] }
  0x42   :  { %744 = vmatprep.subr.bf16.mxu0 %v888_v1  ;;  %v790_v28 = vpack.c.bf16 %v441_v27, %v440_v26 }
  0x43   :  { %761 = vmatpush3.bf16.msra.mxu1 %v760_v48 }
  0x44   :  { %762 = vmatprep.subr.bf16.mxu1 %v888_v1 }
  0x45   :  { %746 = vmatpush3.bf16.msra.mxu0 %v745_v30  ;;  %v443_v30 = vld [vmem:[%s1142_s7 + $0x68] sm:$0xff] }
  0x46   :  { %747 = vmatprep.subr.bf16.mxu0 %v888_v1  ;;  %v793_v31 = vpack.c.bf16 %v443_v30, %v442_v29 }
  0x47   :  { %764 = vmatpush3.bf16.msra.mxu1 %v763_v51 }
  0x48   :  { %765 = vmatprep.subr.bf16.mxu1 %v888_v1 }
  0x49   :  { %749 = vmatpush3.bf16.msra.mxu0 %v748_v36 }
  0x4a   :  { %774 = vmatprep.subr.bf16.mxu0 %v888_v1 }
  0x4b   :  { %767 = vmatpush3.bf16.msra.mxu1 %v766_v54 }
  0x4c   :  { %768 = vmatprep.subr.bf16.mxu1 %v888_v1 }
  0x4f   :  { %770 = vmatpush3.bf16.msra.mxu1 %v769_v6 }
  0x50   :  { %771 = vmatprep.subr.bf16.mxu1 %v888_v1 }
  0x53   :  { %773 = vmatpush3.bf16.msra.mxu1 %v772_v11 }
 0x102   :  { %v148_v56 = vpop.f32.mrb[0].mxu1 }
 0x103   :  { %v230_v57 = vadd.f32 %v546_v55, %v148_v56  ;;  %v150_v58 = vpop.f32.mrb[1].mxu1 }
 0x104   :  { %v232_v59 = vadd.f32 %v546_v55, %v150_v58 }
 0x105   :  { %v231_v60 = vmax.f32 %v230_v57, 0.0 }
 0x106   :  { %v233_v61 = vmax.f32 %v232_v59, 0.0 }
 0x107   :  { %vm236_vm6 = vcmp.ne.f32.partialorder %v231_v60, %v231_v60 }
 0x108   :  { %v234_v62 = vadd.f32 %v233_v61, %v231_v60  ;;  %vm237_vm5 = vcmp.ne.f32.partialorder %v233_v61, %v233_v61  ;;  %v219_v7 = vpop.f32.mrb[2].mxu1 }
 0x109   :  { %v610_v8 = vpop.f32.mrb[3].mxu1 }
 0x10a   :  { %v235_v63 = vmul.f32 0.5, %v234_v62 }
 0x10c   :  { %v238_v2 = vsel %vm237_vm5, %v231_v60, %v235_v63 }
 0x10d   :  { %v239_v3 = vsel %vm236_vm6, %v233_v61, %v238_v2 }
 0x10e   :  { %644 = vmatmul.mubr.f32.vlgmr.msra.gmra.mrb[0].mxu0 %v239_v3 }
 0x10f   :  { %713 = vmatprep.mubr.msk.f32.mxu0 %vm890_vm4, %v887_v0  ;;  %v431_v0 = vld [vmem:[%s1142_s7 + $0x8] sm:$0xff]  ;;  %s853_s7 = scalar_lea.vmem %s532_s13, 128 }
 0x110   :  { %v775_v14 = vpack.c.bf16 %v431_v0, %v430_v12  ;;  %p854_p2 = scmp.ne.s32.totalorder %s532_s13, %s853_s7  ;;  %p859_p4 = scmp.lt.s32.totalorder %s853_s7, %s853_s7 }
 0x112   :  { %776 = vmatpush3.bf16.msra.mxu0 %v775_v14  ;;  %p860_p5 = por %p859_p4, %p858_p3 }
 0x113   :  { %777 = vmatprep.subr.bf16.mxu0 %v888_v1 }
 0x114   :  { %p861_p6 = pnand %p860_p5, %p854_p2 }
 0x116   :  { %779 = vmatpush3.bf16.msra.mxu0 %v778_v16 }
 0x117   :  { %780 = vmatprep.subr.bf16.mxu0 %v888_v1 }
 0x11a   :  { %782 = vmatpush3.bf16.msra.mxu0 %v781_v19 }
 0x11b   :  { %783 = vmatprep.subr.bf16.mxu0 %v888_v1 }
 0x11e   :  { %785 = vmatpush3.bf16.msra.mxu0 %v784_v22 }
 0x11f   :  { %786 = vmatprep.subr.bf16.mxu0 %v888_v1 }
 0x122   :  { %788 = vmatpush3.bf16.msra.mxu0 %v787_v25 }
 0x123   :  { %789 = vmatprep.subr.bf16.mxu0 %v888_v1 }
 0x126   :  { %791 = vmatpush3.bf16.msra.mxu0 %v790_v28 }
 0x127   :  { %792 = vmatprep.subr.bf16.mxu0 %v888_v1 }
 0x12a   :  { %794 = vmatpush3.bf16.msra.mxu0 %v793_v31 }
 0x12b   :  { %795 = vmatprep.subr.bf16.mxu0 %v888_v1  ;;  %v548_v1 = vld [vmem:[%s1141_s6] ss:$0 sm:$0xff] }
 0x12e   :  { %797 = vmatpush3.bf16.msra.mxu0 %v796_v40 }
 0x1e1   :  { %v322_v32 = vpop.f32.mrb[0].mxu0 }
 0x1e2   :  { %v326_v34 = vadd.f32 %v322_v32, %v219_v7  ;;  %v645_v35 = vpop.f32.mrb[1].mxu0 }
 0x1e4   :  { %v334_v36 = vadd.f32 %v547_v33, %v326_v34 }
 0x1e6   :  { %v335_v37 = vmax.f32 %v334_v36, 0.0 }
 0x1e8   :  { %679 = vmatmul.mubr.f32.vlgmr.msra.gmra.mrb[4].mxu1 %v335_v37 }
 0x2bb   :  { %v425_v41 = vpop.f32.mrb[4].mxu1 }
 0x2bc   :  { %v426_v42 = vadd.f32 %v548_v1, %v425_v41  ;;  %v680_v43 = vpop.f32.mrb[5].mxu1 }
 0x2be   :  { %v429_v44 = vmax.f32 %v426_v42, 0.0 }
 0x2c0   :  { %714 = vmatmul.mubr.f32.vlgmr.msra.gmra.mrb[2].mxu0 %v429_v44 }
 0x393   :  { %v519_v46 = vpop.f32.mrb[2].mxu0 }
 0x394   :  { %v520_v47 = vadd.f32 %v549_v45, %v519_v46  ;;  %v715_v48 = vpop.f32.mrb[3].mxu0 }
 0x396   :  { %524 = vst.msk [vmem:[#allocation7] sm:$0xff] %vm523_vm7, %v520_v47 }
 0x397   :  { %864 = shalt.err (!%p861_p6)
}
 0x398   :  { %s865_s5 = scalar_lea.hbm %s1144_s9, 128 }
 0x399   :  { %p866_p7 = scmp.ne.s32.totalorder %s1144_s9, %s865_s5  ;;  %p869_p8 = scmp.lt.u32.totalorder %s865_s5, %s1144_s9 }
 0x39b   :  { %p871_p9 = pnand %p869_p8, %p866_p7 }
 0x39d   :  { %874 = shalt.err (!%p871_p9)
}
 0x39e   :  { %534 = dma.vmem_to_hbm [thread:$0]  %s532_s13, 128, %s1144_s9, [#allocation4]  }
 0x39f   :  { %879 = dma.done.wait [#allocation4], 128  }
 0x3a0   :  { %880 = vsyncadd [#allocation4], 4294967168 }
 0x3a1   :  { %538 = vsyncpa [#allocation3], 1 }
 0x3a2   :  { %539 = vsyncpa [#allocation6], 1 }
 0x3a3   :  { %540 = vsyncpa [#allocation4], 1 }

</bundles_post_ra>
